<compile_context>
chip_gen: v6e
topology: v6e:2x2x1
jax: 0.10.0
libtpu: 0.0.40
codegen_flags: <defaults>
</compile_context>

<pallas_src>
import jax
import jax.numpy as jnp
from jax.experimental import pallas as pl
from jax.experimental.pallas import tpu as pltpu


def _pool_kernel(x_ref, sum_ref):
    # x_ref:   (1, C, T_HW)  one spatial tile of one batch element
    # sum_ref: (1, C, 1)     per-(batch, channel) spatial-sum accumulator
    @pl.when(pl.program_id(1) == 0)
    def _():
        sum_ref[...] = jnp.zeros_like(sum_ref)

    sum_ref[...] += jnp.sum(
        x_ref[...].astype(jnp.float32), axis=-1, keepdims=True)


def _scale_kernel(x_ref, gate_ref, o_ref):
    # x_ref:    (1, C, T_HW)
    # gate_ref: (1, C, 1)    per-(batch, channel) sigmoid gate (f32)
    # o_ref:    (1, C, T_HW)
    o_ref[...] = (x_ref[...].astype(jnp.float32) * gate_ref[...]).astype(o_ref.dtype)


def _pick_spatial_tile(C, HW):
    """Lane-aligned HW tile; keeps one (C, T) f32 buffer ~<= 2 MiB so that
    double-buffered in + out stays well inside the 32 MiB default scoped VMEM
    (and v7x's 64 MiB physical VMEM)."""
    budget_bytes = 2 * 1024 * 1024
    t = (budget_bytes // (max(C, 1) * 4)) // 128 * 128
    t = max(128, t)
    hw_rounded = ((HW + 127) // 128) * 128
    return min(t, hw_rounded)


def eca_attention1(x, fc_w, conv_w, conv_b):
    """x: (B, C, H, W) NCHW. fc_w: (C, C). conv_w: (C, C, 1, 1). conv_b: (C,)."""
    B, C, H, W = x.shape
    HW = H * W
    out_dtype = x.dtype

    # Fold the two gate branches into one weight (GAP-conv fusion, exact).
    w_sum = (fc_w + conv_w.reshape(C, C)).astype(jnp.float32)       # (C, C)
    b_vec = conv_b.astype(jnp.float32)                              # (C,)

    # Lane-aligned spatial tiling (pad HW up to a multiple of the tile).
    t_hw = _pick_spatial_tile(C, HW)
    hw_pad = ((HW + t_hw - 1) // t_hw) * t_hw
    n_t = hw_pad // t_hw

    x_flat = x.reshape(B, C, HW)
    if hw_pad != HW:
        x_flat = jnp.pad(x_flat, ((0, 0), (0, 0), (0, hw_pad - HW)))

    # ---- Pass 1: per-batch, per-channel spatial sums (tiled reduction) ----
    sums = pl.pallas_call(
        _pool_kernel,
        out_shape=jax.ShapeDtypeStruct((B, C, 1), jnp.float32),
        grid_spec=pltpu.PrefetchScalarGridSpec(
            num_scalar_prefetch=0,
            grid=(B, n_t),
            in_specs=[pl.BlockSpec((1, C, t_hw), lambda b, t: (b, 0, t))],
            out_specs=pl.BlockSpec((1, C, 1), lambda b, t: (b, 0, 0)),
        ),
        compiler_params=pltpu.CompilerParams(
            dimension_semantics=("parallel", "arbitrary")),
    )(x_flat)

    # ---- Gate: tiny, batched over B, done in plain JAX (MXU-unfriendly shape) ----
    pooled = sums[:, :, 0] * (1.0 / float(HW))                      # (B, C), true-HW divisor
    gate = jax.nn.sigmoid(pooled @ w_sum.T + b_vec)                 # (B, C)
    gate = gate.reshape(B, C, 1).astype(jnp.float32)

    # ---- Pass 2: pure HBM-bandwidth-bound scale ----
    out = pl.pallas_call(
        _scale_kernel,
        out_shape=jax.ShapeDtypeStruct((B, C, hw_pad), out_dtype),
        grid_spec=pltpu.PrefetchScalarGridSpec(
            num_scalar_prefetch=0,
            grid=(B, n_t),
            in_specs=[
                pl.BlockSpec((1, C, t_hw), lambda b, t: (b, 0, t)),   # x tile
                pl.BlockSpec((1, C, 1), lambda b, t: (b, 0, 0)),      # gate (resident)
            ],
            out_specs=pl.BlockSpec((1, C, t_hw), lambda b, t: (b, 0, t)),
        ),
        compiler_params=pltpu.CompilerParams(
            dimension_semantics=("parallel", "parallel")),
    )(x_flat, gate)

    if hw_pad != HW:
        out = out[:, :, :HW]
    return out.reshape(B, C, H, W)


def _reference(x, fc_w, conv_w, conv_b):
    B, C, H, W = x.shape
    pooled = jnp.mean(x, axis=(2, 3))                                # (B, C)
    y = pooled @ fc_w.T                                              # (B, C)
    conv_out = jnp.einsum('oi,bihw->bohw', conv_w.reshape(C, C), x) \
        + conv_b[None, :, None, None]
    y2 = jnp.mean(conv_out, axis=(2, 3))                             # (B, C)
    gate = jax.nn.sigmoid(y + y2)[:, :, None, None]
    return x * gate


if __name__ == "__main__":
    key = jax.random.PRNGKey(0)
    k_x, k_fc, k_cw, k_cb = jax.random.split(key, 4)

    B, C, H, W = 2, 4, 16, 16
    x = jax.random.normal(k_x, (B, C, H, W), dtype=jnp.float32)

    # Deterministic synthetic parameters (shapes from ECAAttention1.__init__).
    fc_w = 0.001 * jax.random.normal(k_fc, (C, C), dtype=jnp.float32)        # nn.Linear(C, C, bias=False)
    conv_w = 0.1 * jax.random.normal(k_cw, (C, C, 1, 1), dtype=jnp.float32)  # nn.Conv2d(C, C, 1)
    conv_b = 0.1 * jax.random.normal(k_cb, (C,), dtype=jnp.float32)

    out = eca_attention1(x, fc_w, conv_w, conv_b)
    out = jax.block_until_ready(out)

    ref = _reference(x, fc_w, conv_w, conv_b)
    assert out.shape == (B, C, H, W)
    assert jnp.allclose(out, ref, atol=1e-5, rtol=1e-5)

    print("KERNEL_OK")
</pallas_src>

<mosaic_0001>
module attributes {stable_mosaic.version = 11 : i64} {
  func.func @_pool_kernel(%arg0: i32, %arg1: i32, %arg2: memref<1x4x256xf32, #tpu.memory_space<vmem>>, %arg3: memref<1x4x1xf32, #tpu.memory_space<vmem>>) attributes {dimension_semantics = [#tpu.dimension_semantics<parallel>, #tpu.dimension_semantics<arbitrary>], iteration_bounds = array<i64: 2, 1>, scalar_prefetch = 0 : i64, scratch_operands = 0 : i64, tpu.core_type = #tpu.core_type<tc>, window_params = [{transform_indices = @transform_0, window_bounds = array<i64: 1, 4, 256>}, {transform_indices = @transform_1, window_bounds = array<i64: 1, 4, 1>}]} {
    %c0_i32 = arith.constant 0 : i32
    %0 = arith.cmpi eq, %arg1, %c0_i32 : i32
    %1 = arith.extui %0 : i1 to i32
    %c0_i32_0 = arith.constant 0 : i32
    %2 = arith.cmpi ne, %1, %c0_i32_0 : i32
    scf.if %2 {
      %cst_9 = arith.constant 0.000000e+00 : f32
      %9 = vector.broadcast %cst_9 : f32 to vector<1x4x1xf32>
      %c0_10 = arith.constant 0 : index
      %c0_11 = arith.constant 0 : index
      %c0_12 = arith.constant 0 : index
      %10 = vector.load %arg3[%c0_10, %c0_11, %c0_12] : memref<1x4x1xf32, #tpu.memory_space<vmem>>, vector<1x4x1xf32>
      tpu.vector_store %arg3[%c0_10, %c0_11, %c0_12], %9 {strides = array<i32>} : memref<1x4x1xf32, #tpu.memory_space<vmem>>, vector<1x4x1xf32>,
    } else {
    }
    %c0 = arith.constant 0 : index
    %c0_1 = arith.constant 0 : index
    %c0_2 = arith.constant 0 : index
    %3 = vector.load %arg3[%c0, %c0_1, %c0_2] : memref<1x4x1xf32, #tpu.memory_space<vmem>>, vector<1x4x1xf32>
    %c0_3 = arith.constant 0 : index
    %c0_4 = arith.constant 0 : index
    %c0_5 = arith.constant 0 : index
    %4 = vector.load %arg2[%c0_3, %c0_4, %c0_5] : memref<1x4x256xf32, #tpu.memory_space<vmem>>, vector<1x4x256xf32>
    %cst = arith.constant dense<0.000000e+00> : vector<1x4xf32>
    %5 = vector.multi_reduction <add>, %4, %cst [2] : vector<1x4x256xf32> to vector<1x4xf32>
    %6 = vector.shape_cast %5 : vector<1x4xf32> to vector<1x4x1xf32>
    %7 = arith.addf %3, %6 : vector<1x4x1xf32>
    %c0_6 = arith.constant 0 : index
    %c0_7 = arith.constant 0 : index
    %c0_8 = arith.constant 0 : index
    %8 = vector.load %arg3[%c0_6, %c0_7, %c0_8] : memref<1x4x1xf32, #tpu.memory_space<vmem>>, vector<1x4x1xf32>
    tpu.vector_store %arg3[%c0_6, %c0_7, %c0_8], %7 {strides = array<i32>} : memref<1x4x1xf32, #tpu.memory_space<vmem>>, vector<1x4x1xf32>,
    return
  }
  func.func @transform_0(%arg0: i32, %arg1: i32) -> (i32, i32, i32) {
    %c0_i32 = arith.constant 0 : i32
    %c0_i32_0 = arith.constant 0 : i32
    return %arg0, %c0_i32, %arg1 : i32, i32, i32
  }
  func.func @transform_1(%arg0: i32, %arg1: i32) -> (i32, i32, i32) {
    %c0_i32 = arith.constant 0 : i32
    %c0_i32_0 = arith.constant 0 : i32
    %c0_i32_1 = arith.constant 0 : i32
    return %arg0, %c0_i32, %c0_i32_0 : i32, i32, i32
  }
}

</mosaic_0001>

<bundles_post_ra>
// kernel: tpu_custom_call.1
= control target key start
LH: loop header
LB: loop body
LE: loop exit
PB: predicated region body
PF: predicated region fallthrough
CT: control target
= control target key end

     0   :  { %6 = vsyncpa [#allocation3], 0  ;;  %s508_s0 = inlined_call_operand.hbm [shape: f32[2,4,256], index: 0, kind: input, shape index: {}]   ;;  %s509_s1 = inlined_call_operand.vmem [shape: f32[2,4,1], index: 1, kind: output, shape index: {}]  }
   0x1   :  { %8 = vsyncpa [#allocation3 + $0x1], 0  ;;  %s408_s6 = smov 0   ;;  %s410_s7 = smov 0  }
   0x2   :  { %s412_s8 = smov 0   ;;  %s414_s9 = smov 0  }
   0x3   :  { %s416_s10 = smov 0   ;;  %s418_s11 = smov 0  }
   0x4 LB: > { %s246_s12 = sadd.s32 4294967295, %s394_s11   ;;  %s26_s13 = sadd.s32 1, %s390_s10  ;;  %s394_s11 = sphi %s418_s11, %s14_s11   ;;  %s390_s10 = sphi %s416_s10, %s517_s10   ;;  %s386_s9 = sphi %s414_s9, %s516_s9   ;;  %s382_s8 = sphi %s412_s8, %s515_s8   ;;  %s378_s7 = sphi %s410_s7, %s514_s7   ;;  %s374_s6 = sphi %s408_s6, %s513_s6  }
   0x5   : > { %p28_p0 = scmp.ge.s32.totalorder %s26_s13, 2  ;;  %s35_s14 = sadd.s32 1, %s382_s8 }
   0x6   : > { %p42_p1 = scmp.ne.s32.totalorder %s382_s8, %s378_s7  ;;  %p43_p2 = scmp.eq.s32.totalorder %s394_s11, 0 }
   0x7   : > { %s519_s13 = smov (%p28_p0, %s26_s13), 0  ;;  %p48_p4 = scmp.ne.s32.totalorder %s378_s7, %s374_s6 }
   0x8   : > { %p444_p3 = por %p43_p2, %p42_p1  ;;  %s30_s16 = ssub.s32 %s390_s10, %s519_s13 }
   0x9   : > { %p49_p5 = scmp.eq.s32.totalorder %s246_s12, 0  ;;  %p33_p6 = scmp.eq.s32.totalorder %s30_s16, 0 }
   0xa   : > { %p265_p8 = scmp.lt.s32.totalorder %s394_s11, 2  ;;  %s98_s19 = sand.u32 1, %s382_s8  }
   0xb   : > { %p451_p7 = por %p49_p5, %p48_p4  ;;  %s258_s20 = sshll.u32 %s390_s10, 7 }
   0xc   : > { %s457_s18 = scalar_select %p33_p6, %s382_s8, %s35_s14  }
   0xd   : > { %s250_s21 = sshll.u32 %s98_s19, 3  ;;  %s110_s24 = scalar_lea.hbm %s508_s0, %s258_s20 }
   0xe   : > { %s102_s25 = scalar_lea.vmem [#allocation2], %s250_s21  ;;  %p466_p9 = pnand %p265_p8, %p444_p3 }
   0xf   : > { %s112_s26 = sshll.u32 %s102_s25, 4  ;;  %p253_p10 = scmp.ge.s32.totalorder %s394_s11, 1  ;;  %s113_s26 = int_to_ptr.vmem [resolvable:$true] %s112_s26 }
  0x10   : > { %p117_p11 = scmp.lt.s32.totalorder %s394_s11, 3  ;;  %s99_s28 = scalar_lea.sflag [#allocation3], %s98_s19 }
  0x11   : > { %p318_p12 = pneg %p466_p9  ;;  %s329_s29 = scalar_lea.vmem %s113_s26, 128 }
  0x12   : > { %p330_p13 = scmp.ne.s32.totalorder %s113_s26, %s329_s29  ;;  %s396_s30 = smov [#allocation2]  }
  0x13   : > { %s334_s2 = sshll.u32 %s396_s30, 4  ;;  %s335_s2 = int_to_ptr.vmem [resolvable:$false] %s334_s2 }
  0x14   : > { %p332_p0 = pnand %p330_p13, %p318_p12  ;;  %s336_s3 = scalar_lea.vmem %s335_s2, 256 }
  0x15   : > { %p337_p2 = scmp.lt.s32.totalorder %s113_s26, %s335_s2  ;;  %p338_p3 = scmp.lt.s32.totalorder %s336_s3, %s329_s29 }
  0x16   : > { %p333_p1 = pneg %p332_p0 }
  0x17   : > { %p339_p4 = por %p338_p3, %p337_p2 }
  0x19   : > { %p340_p5 = pnand %p339_p4, %p333_p1 }
  0x1b   : > { %343 = shalt.err (!%p340_p5)
}
  0x1c   : > { %264 = dma.hbm_to_vmem [thread:$0]  (!%p466_p9), %s110_s24, 128, %s113_s26, %s99_s28  }
  0x1d   : > { %p118_p6 = pnand %p253_p10, %p117_p11 }
  0x1e   : > { %s123_s4 = sand.u32 (!%p118_p6), 1, %s378_s7  }
  0x1f   : > { %121 = sbr.rel (%p118_p6) target bundleno = 184 (0xb8), region = 24  ;;  %s254_s5 = sshll.u32 (!%p118_p6), %s123_s4, 3 }
  0x20   : > { %s124_s6 = scalar_lea.sflag (!%p118_p6), [#allocation3], %s123_s4  ;;  %s127_s12 = scalar_lea.vmem (!%p118_p6), [#allocation2], %s254_s5 }
  0x24   : > { %369 = dma.done.wait (%p451_p7), %s124_s6, 128  }
  0x25   : > { %371 = vsyncadd (%p451_p7), %s124_s6, 4294967168  ;;  %p146_p8 = scmp.lt.s32.totalorder %s386_s9, 1  ;;  %vm154_vm0 = vcmask 3072   ;;  %vm161_vm1 = vcmask 1043456   ;;  %v397_v0 = vmov 0.0   ;;  %v157_v1 = vld [vmem:[%s127_s12] sm:$0xff] }
  0x26   : > { %v159_v2 = vcombine.high %v157_v1, %v157_v1  ;;  %v162_v3 = vsel %vm161_vm1, %v157_v1, 0.0 }
  0x27   : > { %s521_s9 = smov (!%p146_p8, %s386_s9), 1 }
  0x28   : > { %s255_s14 = sshll.u32 %s521_s9, 2  ;;  %v163_v4 = vsel %vm161_vm1, %v159_v2, 0.0 }
  0x29   : > { %s149_s19 = scalar_lea.vmem %s509_s1, %s255_s14  ;;  %v164_v5 = vadd.f32 %v163_v4, %v162_v3 }
  0x2a   : > { %155 = vst.msk [vmem:[%s149_s19] sm:$0xf] %vm154_vm0, %v397_v0 }
  0x2b   : > { %165 = vadd.xlane.f32.xlu0 %v164_v5 }
  0x31   : > { %v156_v6 = vld [vmem:[%s149_s19] sm:$0xf] }
  0xb4   : > { %v166_v7 = vpop.xlane.xlu0 %165 }
  0xb5   : > { %v167_v8 = vadd.f32 %v166_v7, %v156_v6 }
  0xb7   : > { %169 = vst.msk [vmem:[%s149_s19] sm:$0xf] %vm154_vm0, %v167_v8 }
  0xb8 PF: > { %s14_s11 = sadd.s32 1, %s394_s11   ;;  %s513_s6 = smov %s378_s7 }
  0xb9   : > { %p11_p7 = scmp.ge.s32.totalorder %s14_s11, 4   ;;  %s514_s7 = smov %s382_s8 }
  0xba   : > { %s515_s8 = smov %s457_s18  ;;  %s516_s9 = smov %s390_s10 }
  0xbb   : > { %s517_s10 = smov %s519_s13  ;;  %13 = sbr.rel (!%p11_p7) target bundleno = 4 (0x4), region = 68 }
  0xc0   :  { %189 = vsyncpa [#allocation3], 1 }
  0xc1   :  { %191 = vsyncpa [#allocation3 + $0x1], 1 }

</bundles_post_ra>
